<compile_context>
chip_gen: v5e
topology: v5e:2x2
jax: 0.10.0
libtpu: 0.0.40
codegen_flags: <defaults>
</compile_context>

<pallas_src>
from functools import partial

import jax
import jax.numpy as jnp
from jax.experimental import pallas as pl
from jax.experimental.pallas import tpu as pltpu


def _round_up(n, m):
    return ((n + m - 1) // m) * m


def _wave_block_kernel(kernel_size, dilation, pad_left, bc, t_tile,
                       xwin_ref, wfg_ref, bfg_ref, wout_ref, winj_ref, bout_ref,
                       o_ref):
    """One (batch, time-tile) grid step.

    xwin_ref : (1, 1, t_tile + halo, C)  activation window (left context included)
    wfg_ref  : (K, C, 2*BC)              packed filter||gate dilated-conv weights
    bfg_ref  : (1, 2*BC)                 packed filter||gate bias (f32)
    wout_ref : (BC, OUTP)                packed 1x1 residual||skip weights (lane-dense)
    winj_ref : (C, OUTP)                 identity injection for the "+ x" residual hookup
    bout_ref : (1, OUTP)                 packed residual||skip bias (f32)
    o_ref    : (1, t_tile, OUTP)         res || skip || zero-pad output slab (f32)
    """
    xt = xwin_ref[0, 0]                                       # (t_tile + halo, C)

    # Dilated filter+gate conv = K shifted (t_tile, C) @ (C, 2*BC) matmuls, f32 accumulation.
    # Bias folded into the accumulator init (hoisted broadcast, outside the tap loop).
    acc = jnp.broadcast_to(bfg_ref[...], (t_tile, 2 * bc)).astype(jnp.float32)
    for j in range(kernel_size):
        xs = xt[j * dilation: j * dilation + t_tile, :]       # (t_tile, C), static slice
        acc = acc + jnp.dot(xs, wfg_ref[j], preferred_element_type=jnp.float32)

    filt = jnp.tanh(acc[:, :bc])                              # element-wise kept in f32
    gate = jax.nn.sigmoid(acc[:, bc:])
    gated = (filt * gate).astype(wout_ref.dtype)              # (t_tile, BC)

    # 1x1 residual+skip conv as a single lane-dense matmul; "+x" via identity injection.
    xin = xt[pad_left: pad_left + t_tile, :]                  # un-shifted window == residual x
    y = (jnp.dot(gated, wout_ref[...], preferred_element_type=jnp.float32)
         + jnp.dot(xin, winj_ref[...], preferred_element_type=jnp.float32)
         + bout_ref[...])
    o_ref[0] = y.astype(o_ref.dtype)                          # one unmasked 128-lane store


def pack_params(Wf, bf, Wg, bg, Wr, br, Ws, bs, lane_pad=128):
    """PyTorch layouts in: conv weight (out, in, K), bias (out,). Returns packed params."""
    BC, C, K = Wf.shape
    S = Ws.shape[0]
    outp = _round_up(C + S, lane_pad)
    wfg = jnp.concatenate([jnp.transpose(Wf, (2, 1, 0)),
                           jnp.transpose(Wg, (2, 1, 0))], axis=2)        # (K, C, 2*BC)
    bfg = jnp.concatenate([bf, bg]).reshape(1, 2 * BC).astype(jnp.float32)
    wout = (jnp.zeros((BC, outp), jnp.float32)
            .at[:, :C].set(jnp.transpose(Wr[:, :, 0]))
            .at[:, C:C + S].set(jnp.transpose(Ws[:, :, 0])))             # (BC, OUTP)
    winj = jnp.zeros((C, outp), jnp.float32).at[:, :C].set(jnp.eye(C, dtype=jnp.float32))
    bout = (jnp.zeros((1, outp), jnp.float32)
            .at[0, :C].set(br).at[0, C:C + S].set(bs))
    return wfg, bfg, wout, winj, bout


def wave_residual_block(x, packed_params, *, kernel_size, dilation, skip_channels,
                        causal=True, t_tile=128, compute_dtype=jnp.float32):
    """x: (B, T, residual_channels) float32. Returns (residual, skip)."""
    B, T, C = x.shape
    wfg, bfg, wout, winj, bout = packed_params
    assert wfg.shape[0] == kernel_size and wfg.shape[1] == C
    BC = wfg.shape[2] // 2
    OUTP = wout.shape[1]
    S = skip_channels

    total_pad = dilation * (kernel_size - 1)
    pad_left = total_pad if causal else total_pad // 2

    t_tile = max(8, (min(t_tile, _round_up(T, 8)) // 8) * 8)   # multiple of 8, VMEM-sized
    T_pad = _round_up(T, t_tile)
    nT = T_pad // t_tile
    halo = _round_up(total_pad, 8)
    W = t_tile + halo

    # Temporal zero pad + overlapped (tile + left-context) windows, built once in XLA.
    right_pad = T_pad + halo - pad_left - T
    xpad = jnp.pad(x, ((0, 0), (pad_left, right_pad), (0, 0)))
    win_idx = jnp.arange(nT)[:, None] * t_tile + jnp.arange(W)[None, :]
    xwin = xpad[:, win_idx, :].astype(compute_dtype)           # (B, nT, W, C)

    wfg_c = wfg.astype(compute_dtype)
    wout_c = wout.astype(compute_dtype)
    winj_c = winj.astype(compute_dtype)

    itemsize = jnp.dtype(compute_dtype).itemsize
    cost = pl.CostEstimate(
        flops=int(B * T_pad * (2 * kernel_size * C * 2 * BC + 2 * (BC + C) * OUTP)),
        transcendentals=int(B * T_pad * 2 * BC),
        bytes_accessed=int(xwin.size * itemsize
                           + (wfg_c.size + wout_c.size + winj_c.size) * itemsize
                           + (bfg.size + bout.size) * 4
                           + B * T_pad * OUTP * 4))

    kern = partial(_wave_block_kernel, kernel_size, dilation, pad_left, BC, t_tile)
    out = pl.pallas_call(
        kern,
        grid=(B, nT),
        in_specs=[
            pl.BlockSpec((1, 1, W, C), lambda b, t: (b, t, 0, 0)),            # activations
            pl.BlockSpec((kernel_size, C, 2 * BC), lambda b, t: (0, 0, 0)),   # resident weights
            pl.BlockSpec((1, 2 * BC), lambda b, t: (0, 0)),
            pl.BlockSpec((BC, OUTP), lambda b, t: (0, 0)),
            pl.BlockSpec((C, OUTP), lambda b, t: (0, 0)),
            pl.BlockSpec((1, OUTP), lambda b, t: (0, 0)),
        ],
        out_specs=pl.BlockSpec((1, t_tile, OUTP), lambda b, t: (b, t, 0)),
        out_shape=jax.ShapeDtypeStruct((B, T_pad, OUTP), jnp.float32),
        compiler_params=pltpu.CompilerParams(
            dimension_semantics=("parallel", "parallel"),
            vmem_limit_bytes=32 * 1024 * 1024),
        cost_estimate=cost,
    )(xwin, wfg_c, bfg, wout_c, winj_c, bout)

    res = out[:, :T, :C]            # "+x" and bias already applied in-kernel
    skip = out[:, :T, C:C + S]
    return res, skip


# ----------------------------- reference (pure JAX) -----------------------------
def _reference(x, pt_params, *, kernel_size, dilation, causal=True):
    Wf, bf, Wg, bg, Wr, br, Ws, bs = pt_params            # PyTorch (out, in, K) layouts
    total_pad = dilation * (kernel_size - 1)
    pad = (total_pad, 0) if causal else (total_pad // 2, total_pad - total_pad // 2)
    xp = jnp.pad(x, ((0, 0), pad, (0, 0)))

    def conv(x_btc, W, b, dil):
        y = jax.lax.conv_general_dilated(
            jnp.transpose(x_btc, (0, 2, 1)), W, window_strides=(1,),
            padding='VALID', rhs_dilation=(dil,),
            dimension_numbers=('NCH', 'OIH', 'NCH'))
        return jnp.transpose(y, (0, 2, 1)) + b

    f = jnp.tanh(conv(xp, Wf, bf, dilation))
    g = jax.nn.sigmoid(conv(xp, Wg, bg, dilation))
    out = f * g
    return conv(out, Wr, br, 1) + x, conv(out, Ws, bs, 1)


# ----------------------------------- main ----------------------------------------
if __name__ == "__main__":
    B, T = 2, 64
    residual_channels, block_channels, skip_channels = 8, 16, 8
    kernel_size, dilation_rate = 3, 2

    key = jax.random.PRNGKey(0)
    ks = jax.random.split(key, 9)

    def uinit(k, shape, fan_in):
        bound = 1.0 / jnp.sqrt(fan_in)
        return jax.random.uniform(k, shape, jnp.float32, -bound, bound)

    # PyTorch-layout parameters: conv weight (out, in, K), bias (out,)
    Wf = uinit(ks[0], (block_channels, residual_channels, kernel_size),
               residual_channels * kernel_size)
    bf = uinit(ks[1], (block_channels,), residual_channels * kernel_size)
    Wg = uinit(ks[2], (block_channels, residual_channels, kernel_size),
               residual_channels * kernel_size)
    bg = uinit(ks[3], (block_channels,), residual_channels * kernel_size)
    Wr = uinit(ks[4], (residual_channels, block_channels, 1), block_channels)
    br = uinit(ks[5], (residual_channels,), block_channels)
    Ws = uinit(ks[6], (skip_channels, block_channels, 1), block_channels)
    bs = uinit(ks[7], (skip_channels,), block_channels)

    x = jax.random.normal(ks[8], (B, T, residual_channels), jnp.float32)

    packed = pack_params(Wf, bf, Wg, bg, Wr, br, Ws, bs)
    pt_params = (Wf, bf, Wg, bg, Wr, br, Ws, bs)

    # --- causal, f32 matmuls (tight check) ---
    res, skip = wave_residual_block(
        x, packed, kernel_size=kernel_size, dilation=dilation_rate,
        skip_channels=skip_channels, causal=True, t_tile=16,
        compute_dtype=jnp.float32)
    jax.block_until_ready((res, skip))
    res_ref, skip_ref = _reference(x, pt_params, kernel_size=kernel_size,
                                   dilation=dilation_rate, causal=True)
    assert res.shape == (B, T, residual_channels) and skip.shape == (B, T, skip_channels)
    assert jnp.allclose(res, res_ref, atol=1e-4, rtol=1e-4)
    assert jnp.allclose(skip, skip_ref, atol=1e-4, rtol=1e-4)

    # --- causal, bf16 matmul operands (v6e/v7x fast path), f32 accumulation/element-wise ---
    res_b, skip_b = wave_residual_block(
        x, packed, kernel_size=kernel_size, dilation=dilation_rate,
        skip_channels=skip_channels, causal=True, t_tile=16,
        compute_dtype=jnp.bfloat16)
    jax.block_until_ready((res_b, skip_b))
    assert jnp.allclose(res_b, res_ref, atol=5e-2, rtol=5e-2)
    assert jnp.allclose(skip_b, skip_ref, atol=5e-2, rtol=5e-2)

    # --- non-causal, ragged T (not a multiple of the time tile), f32 ---
    x2 = jax.random.normal(jax.random.PRNGKey(1), (B, 40, residual_channels), jnp.float32)
    res2, skip2 = wave_residual_block(
        x2, packed, kernel_size=kernel_size, dilation=dilation_rate,
        skip_channels=skip_channels, causal=False, t_tile=16,
        compute_dtype=jnp.float32)
    jax.block_until_ready((res2, skip2))
    res2_ref, skip2_ref = _reference(x2, pt_params, kernel_size=kernel_size,
                                     dilation=dilation_rate, causal=False)
    assert jnp.allclose(res2, res2_ref, atol=1e-4, rtol=1e-4)
    assert jnp.allclose(skip2, skip2_ref, atol=1e-4, rtol=1e-4)

    print("KERNEL_OK")
</pallas_src>

<mosaic_0001>
module attributes {stable_mosaic.version = 11 : i64} {
  func.func @_wave_block_kernel(%arg0: i32, %arg1: i32, %arg2: memref<1x1x24x8xf32, #tpu.memory_space<vmem>>, %arg3: memref<3x8x32xf32, #tpu.memory_space<vmem>>, %arg4: memref<1x32xf32, #tpu.memory_space<vmem>>, %arg5: memref<16x128xf32, #tpu.memory_space<vmem>>, %arg6: memref<8x128xf32, #tpu.memory_space<vmem>>, %arg7: memref<1x128xf32, #tpu.memory_space<vmem>>, %arg8: memref<1x16x128xf32, #tpu.memory_space<vmem>>) attributes {dimension_semantics = [#tpu.dimension_semantics<parallel>, #tpu.dimension_semantics<parallel>], iteration_bounds = array<i64: 2, 4>, scalar_prefetch = 0 : i64, scratch_operands = 0 : i64, tpu.core_type = #tpu.core_type<tc>, window_params = [{transform_indices = @transform_0, window_bounds = array<i64: 1, 1, 24, 8>}, {pipeline_mode = #tpu.pipeline_mode<synchronous>, transform_indices = @transform_1, window_bounds = array<i64: 3, 8, 32>}, {pipeline_mode = #tpu.pipeline_mode<synchronous>, transform_indices = @transform_2, window_bounds = array<i64: 1, 32>}, {pipeline_mode = #tpu.pipeline_mode<synchronous>, transform_indices = @transform_3, window_bounds = array<i64: 16, 128>}, {pipeline_mode = #tpu.pipeline_mode<synchronous>, transform_indices = @transform_4, window_bounds = array<i64: 8, 128>}, {pipeline_mode = #tpu.pipeline_mode<synchronous>, transform_indices = @transform_5, window_bounds = array<i64: 1, 128>}, {transform_indices = @transform_6, window_bounds = array<i64: 1, 16, 128>}]} {
    %c0 = arith.constant 0 : index
    %c0_0 = arith.constant 0 : index
    %c0_1 = arith.constant 0 : index
    %c0_2 = arith.constant 0 : index
    %0 = vector.load %arg2[%c0, %c0_0, %c0_1, %c0_2] : memref<1x1x24x8xf32, #tpu.memory_space<vmem>>, vector<1x1x24x8xf32>
    %1 = vector.shape_cast %0 : vector<1x1x24x8xf32> to vector<24x8xf32>
    %c0_3 = arith.constant 0 : index
    %c0_4 = arith.constant 0 : index
    %2 = vector.load %arg4[%c0_3, %c0_4] : memref<1x32xf32, #tpu.memory_space<vmem>>, vector<1x32xf32>
    %3 = vector.shape_cast %2 : vector<1x32xf32> to vector<1x32xf32>
    %4 = vector.broadcast %3 : vector<1x32xf32> to vector<16x32xf32>
    %5 = vector.extract_strided_slice %1 {offsets = [0, 0], sizes = [16, 8], strides = [1, 1]} : vector<24x8xf32> to vector<16x8xf32>
    %c0_5 = arith.constant 0 : index
    %c0_6 = arith.constant 0 : index
    %c0_7 = arith.constant 0 : index
    %6 = vector.load %arg3[%c0_5, %c0_6, %c0_7] : memref<3x8x32xf32, #tpu.memory_space<vmem>>, vector<1x8x32xf32>
    %7 = vector.shape_cast %6 : vector<1x8x32xf32> to vector<8x32xf32>
    %cst = arith.constant dense<0.000000e+00> : vector<16x32xf32>
    %8 = tpu.matmul %5, %7, %cst {dimension_numbers = #tpu.dot_dimension_numbers<[1], [0], [0], [1], [0, 0, 1, 1], [], []>} : vector<16x8xf32>, vector<8x32xf32>, vector<16x32xf32> -> vector<16x32xf32>
    %9 = arith.addf %4, %8 : vector<16x32xf32>
    %10 = vector.extract_strided_slice %1 {offsets = [2, 0], sizes = [16, 8], strides = [1, 1]} : vector<24x8xf32> to vector<16x8xf32>
    %c1 = arith.constant 1 : index
    %c0_8 = arith.constant 0 : index
    %c0_9 = arith.constant 0 : index
    %11 = vector.load %arg3[%c1, %c0_8, %c0_9] : memref<3x8x32xf32, #tpu.memory_space<vmem>>, vector<1x8x32xf32>
    %12 = vector.shape_cast %11 : vector<1x8x32xf32> to vector<8x32xf32>
    %cst_10 = arith.constant dense<0.000000e+00> : vector<16x32xf32>
    %13 = tpu.matmul %10, %12, %cst_10 {dimension_numbers = #tpu.dot_dimension_numbers<[1], [0], [0], [1], [0, 0, 1, 1], [], []>} : vector<16x8xf32>, vector<8x32xf32>, vector<16x32xf32> -> vector<16x32xf32>
    %14 = arith.addf %9, %13 : vector<16x32xf32>
    %15 = vector.extract_strided_slice %1 {offsets = [4, 0], sizes = [16, 8], strides = [1, 1]} : vector<24x8xf32> to vector<16x8xf32>
    %c2 = arith.constant 2 : index
    %c0_11 = arith.constant 0 : index
    %c0_12 = arith.constant 0 : index
    %16 = vector.load %arg3[%c2, %c0_11, %c0_12] : memref<3x8x32xf32, #tpu.memory_space<vmem>>, vector<1x8x32xf32>
    %17 = vector.shape_cast %16 : vector<1x8x32xf32> to vector<8x32xf32>
    %cst_13 = arith.constant dense<0.000000e+00> : vector<16x32xf32>
    %18 = tpu.matmul %15, %17, %cst_13 {dimension_numbers = #tpu.dot_dimension_numbers<[1], [0], [0], [1], [0, 0, 1, 1], [], []>} : vector<16x8xf32>, vector<8x32xf32>, vector<16x32xf32> -> vector<16x32xf32>
    %19 = arith.addf %14, %18 : vector<16x32xf32>
    %20 = vector.extract_strided_slice %19 {offsets = [0, 0], sizes = [16, 16], strides = [1, 1]} : vector<16x32xf32> to vector<16x16xf32>
    %21 = math.tanh %20 : vector<16x16xf32>
    %22 = vector.extract_strided_slice %19 {offsets = [0, 16], sizes = [16, 16], strides = [1, 1]} : vector<16x32xf32> to vector<16x16xf32>
    %23 = arith.negf %22 : vector<16x16xf32>
    %24 = math.exp %23 : vector<16x16xf32>
    %cst_14 = arith.constant 1.000000e+00 : f32
    %25 = vector.broadcast %cst_14 : f32 to vector<16x16xf32>
    %26 = arith.addf %25, %24 : vector<16x16xf32>
    %27 = arith.divf %25, %26 : vector<16x16xf32>
    %28 = arith.mulf %21, %27 : vector<16x16xf32>
    %29 = vector.extract_strided_slice %1 {offsets = [4, 0], sizes = [16, 8], strides = [1, 1]} : vector<24x8xf32> to vector<16x8xf32>
    %c0_15 = arith.constant 0 : index
    %c0_16 = arith.constant 0 : index
    %30 = vector.load %arg5[%c0_15, %c0_16] : memref<16x128xf32, #tpu.memory_space<vmem>>, vector<16x128xf32>
    %cst_17 = arith.constant dense<0.000000e+00> : vector<16x128xf32>
    %31 = tpu.matmul %28, %30, %cst_17 {dimension_numbers = #tpu.dot_dimension_numbers<[1], [0], [0], [1], [0, 0, 1, 1], [], []>} : vector<16x16xf32>, vector<16x128xf32>, vector<16x128xf32> -> vector<16x128xf32>
    %c0_18 = arith.constant 0 : index
    %c0_19 = arith.constant 0 : index
    %32 = vector.load %arg6[%c0_18, %c0_19] : memref<8x128xf32, #tpu.memory_space<vmem>>, vector<8x128xf32>
    %cst_20 = arith.constant dense<0.000000e+00> : vector<16x128xf32>
    %33 = tpu.matmul %29, %32, %cst_20 {dimension_numbers = #tpu.dot_dimension_numbers<[1], [0], [0], [1], [0, 0, 1, 1], [], []>} : vector<16x8xf32>, vector<8x128xf32>, vector<16x128xf32> -> vector<16x128xf32>
    %34 = arith.addf %31, %33 : vector<16x128xf32>
    %c0_21 = arith.constant 0 : index
    %c0_22 = arith.constant 0 : index
    %35 = vector.load %arg7[%c0_21, %c0_22] : memref<1x128xf32, #tpu.memory_space<vmem>>, vector<1x128xf32>
    %36 = vector.broadcast %35 : vector<1x128xf32> to vector<16x128xf32>
    %37 = arith.addf %34, %36 : vector<16x128xf32>
    %c0_23 = arith.constant 0 : index
    %c0_24 = arith.constant 0 : index
    %c0_25 = arith.constant 0 : index
    %38 = vector.load %arg8[%c0_23, %c0_24, %c0_25] : memref<1x16x128xf32, #tpu.memory_space<vmem>>, vector<1x16x128xf32>
    %39 = vector.shape_cast %38 : vector<1x16x128xf32> to vector<16x128xf32>
    %40 = vector.shape_cast %37 : vector<16x128xf32> to vector<1x16x128xf32>
    tpu.vector_store %arg8[%c0_23, %c0_24, %c0_25], %40 {strides = array<i32>} : memref<1x16x128xf32, #tpu.memory_space<vmem>>, vector<1x16x128xf32>,
    return
  }
  func.func @transform_0(%arg0: i32, %arg1: i32) -> (i32, i32, i32, i32) {
    %c0_i32 = arith.constant 0 : i32
    %c0_i32_0 = arith.constant 0 : i32
    %c0_i32_1 = arith.constant 0 : i32
    return %arg0, %arg1, %c0_i32, %c0_i32_0 : i32, i32, i32, i32
  }
  func.func @transform_1(%arg0: i32, %arg1: i32) -> (i32, i32, i32) {
    %c0_i32 = arith.constant 0 : i32
    %c0_i32_0 = arith.constant 0 : i32
    %c0_i32_1 = arith.constant 0 : i32
    %c0_i32_2 = arith.constant 0 : i32
    return %c0_i32, %c0_i32_0, %c0_i32_1 : i32, i32, i32
  }
  func.func @transform_2(%arg0: i32, %arg1: i32) -> (i32, i32) {
    %c0_i32 = arith.constant 0 : i32
    %c0_i32_0 = arith.constant 0 : i32
    %c0_i32_1 = arith.constant 0 : i32
    return %c0_i32, %c0_i32_0 : i32, i32
  }
  func.func @transform_3(%arg0: i32, %arg1: i32) -> (i32, i32) {
    %c0_i32 = arith.constant 0 : i32
    %c0_i32_0 = arith.constant 0 : i32
    %c0_i32_1 = arith.constant 0 : i32
    return %c0_i32, %c0_i32_0 : i32, i32
  }
  func.func @transform_4(%arg0: i32, %arg1: i32) -> (i32, i32) {
    %c0_i32 = arith.constant 0 : i32
    %c0_i32_0 = arith.constant 0 : i32
    %c0_i32_1 = arith.constant 0 : i32
    return %c0_i32, %c0_i32_0 : i32, i32
  }
  func.func @transform_5(%arg0: i32, %arg1: i32) -> (i32, i32) {
    %c0_i32 = arith.constant 0 : i32
    %c0_i32_0 = arith.constant 0 : i32
    %c0_i32_1 = arith.constant 0 : i32
    return %c0_i32, %c0_i32_0 : i32, i32
  }
  func.func @transform_6(%arg0: i32, %arg1: i32) -> (i32, i32, i32) {
    %c0_i32 = arith.constant 0 : i32
    %c0_i32_0 = arith.constant 0 : i32
    return %arg0, %arg1, %c0_i32 : i32, i32, i32
  }
}

</mosaic_0001>

<bundles_post_ra>
// kernel: tpu_custom_call.1
= control target key start
LH: loop header
LB: loop body
LE: loop exit
PB: predicated region body
PF: predicated region fallthrough
CT: control target
= control target key end

     0   :  { %11 = vsyncpa [#allocation3], 0  ;;  %s1017_s0 = inlined_call_operand.vmem [shape: f32[2,4,24,8], index: 0, kind: input, shape index: {}]   ;;  %s1018_s1 = inlined_call_operand.vmem [shape: f32[3,8,32], index: 1, kind: input, shape index: {}]   ;;  %s1019_s2 = inlined_call_operand.vmem [shape: f32[1,32], index: 2, kind: input, shape index: {}]   ;;  %s1020_s3 = inlined_call_operand.vmem [shape: f32[16,128], index: 3, kind: input, shape index: {}]   ;;  %s1021_s4 = inlined_call_operand.vmem [shape: f32[8,128], index: 4, kind: input, shape index: {}]   ;;  %s1022_s5 = inlined_call_operand.vmem [shape: f32[1,128], index: 5, kind: input, shape index: {}]   ;;  %s1023_s6 = inlined_call_operand.hbm [shape: f32[2,64,128], index: 6, kind: output, shape index: {}]  }
   0x1   :  { %13 = vsyncpa [#allocation3 + $0x1], 0  ;;  %s863_s21 = smov 0   ;;  %s865_s22 = smov 0  }
   0x2   :  { %s867_s23 = smov 0   ;;  %s869_s24 = smov 0  }
   0x3   :  { %s871_s25 = smov 0   ;;  %s873_s26 = smov 0  }
   0x4   :  { %s875_s27 = smov 0   ;;  %s877_s28 = smov 0  }
   0x5 LB: > { %s611_s29 = sadd.s32 4294967295, %s823_s28   ;;  %s612_s30 = sadd.s32 4294967294, %s823_s28   ;;  %s823_s28 = sphi %s877_s28, %s19_s28   ;;  %s819_s27 = sphi %s875_s27, %s1035_s27   ;;  %s815_s26 = sphi %s873_s26, %s1034_s26   ;;  %s811_s25 = sphi %s871_s25, %s1033_s25   ;;  %s807_s24 = sphi %s869_s24, %s1032_s24   ;;  %s803_s23 = sphi %s867_s23, %s1031_s23   ;;  %s799_s22 = sphi %s865_s22, %s1030_s22   ;;  %s795_s21 = sphi %s863_s21, %s1029_s21  }
   0x6   : > { %s28_s7 = sadd.s32 1, %s815_s26  ;;  %s31_s8 = sadd.s32 1, %s819_s27 }
   0x7   : > { %p29_p0 = scmp.ge.s32.totalorder %s28_s7, 4  ;;  %p183_p1 = scmp.ne.s32.totalorder %s803_s23, %s799_s22 }
   0x8   : > { %p184_p2 = scmp.eq.s32.totalorder %s611_s29, 7  ;;  %p189_p5 = scmp.ne.s32.totalorder %s799_s22, %s795_s21 }
   0x9   : > { %s1037_s7 = smov (%p29_p0, %s28_s7), 0  ;;  %s1039_s8 = smov (!%p29_p0, %s31_s8), %s819_s27 }
   0xa   : > { %s169_s9 = ssub.s32 %s815_s26, %s1037_s7  ;;  %p914_p3 = por %p184_p2, %p183_p1 }
   0xb   : > { %p33_p4 = scmp.ge.s32.totalorder %s1039_s8, 2  ;;  %p190_p6 = scmp.eq.s32.totalorder %s612_s30, 7 }
   0xc   : > { %p615_p7 = scmp.ge.s32.totalorder %s823_s28, 1  ;;  %p235_p9 = scmp.lt.s32.totalorder %s823_s28, 9 }
   0xd   : > { %s1041_s8 = smov (%p33_p4, %s1039_s8), 0  ;;  %p923_p8 = por %p190_p6, %p189_p5 }
   0xe   : > { %1026 = sst [smem:[#allocation5_spill]] %s1041_s8  ;;  %s168_s12 = ssub.s32 %s819_s27, %s1041_s8 }
   0xf   : > { %s173_s13 = sadd.s32 1, %s803_s23  ;;  %s170_s14 = sor.u32 %s169_s9, %s168_s12 }
  0x10   : > { %p236_p10 = pnand %p615_p7, %p235_p9  ;;  %p171_p11 = scmp.eq.s32.totalorder %s170_s14, 0 }
  0x11   : > { %p269_p12 = scmp.lt.s32.totalorder (!%p236_p10), %s811_s25, 1  ;;  %p271_p13 = scmp.lt.s32.totalorder (!%p236_p10), %s807_s24, 3 }
  0x12   : > { %s932_s15 = scalar_select %p171_p11, %s803_s23, %s173_s13  }
  0x13   : > { %239 = sbr.rel (%p236_p10) target bundleno = 458 (0x1ca), region = 44  ;;  %s634_s17 = sshll.u32 (!%p236_p10), %s811_s25, 3 }
  0x14   : > { %s749_s29 = scalar_lea.hbm (!%p236_p10), %s1023_s6, 128 }
  0x18   : > { %v286_v0 = vld [vmem:[%s1018_s1] sm:$0xff]  ;;  %v620_v1 = vld [vmem:[%s1018_s1 + $0x8] sm:$0xff]  ;;  %v623_v2 = vld [vmem:[%s1018_s1 + $0x10] sm:$0xff]  ;;  %s270_s30 = scalar_select %p269_p12, %s811_s25, 1  ;;  %vm287_vm0 = vcmask 64512   ;;  %vm359_vm1 = vcmask 1043456  }
  0x19   : > { %638 = vmatpush.msra.mxu1 %v286_v0  ;;  %384 = vmatpush.msra.mxu2 %v623_v2  ;;  %s272_s9 = scalar_select %p271_p13, %s807_s24, 3  ;;  %vm322_vm2 = vcmask 1045504   ;;  %v715_v18 = vld [vmem:[%s1019_s2] ss:$0 sm:$0xff]  ;;  %v445_v29 = vld [vmem:[%s1020_s3 + $0x8] sm:$0xff]  ;;  %vm470_vm11 = vcmask 130048  }
  0x1a   : > { %309 = vmatpush.msra.mxu0 %v286_v0  ;;  %s640_s12 = smul.u32 12, %s270_s30  ;;  %v446_v30 = vld [vmem:[%s1021_s4] sm:$0xff] }
  0x1b   : > { %347 = vmatpush.msrb.mxu1 %v620_v1  ;;  %s639_s13 = smul.u32 3, %s272_s9  ;;  %v444_v31 = vld [vmem:[%s1020_s3] sm:$0xff]  ;;  %462 = vmatpush.msra.mxu3 %v446_v30 }
  0x1c   : > { %491 = vmatpush.msrb.mxu0 %v445_v29  ;;  %v716_v1 = vld [vmem:[%s1022_s5] ss:$0 sm:$0xff] }
  0x1d   : > { %s275_s14 = sadd.s32 %s640_s12, %s639_s13 }
  0x1e   : > { %s617_s16 = sshll.u32 %s275_s14, 3  ;;  %492 = vmatpush.msrb.mxu0 %v444_v31  ;;  %s825_s14 = smov 112  }
  0x1f   : > { %s277_s18 = scalar_lea.vmem %s1017_s0, %s617_s16  ;;  %s633_s16 = sshll.u32 %s807_s24, 1 }
  0x20   : > { %v279_v3 = vld [vmem:[%s277_s18] sm:$0xff]  ;;  %v280_v4 = vld [vmem:[%s277_s18 + $0x8] sm:$0xff]  ;;  %v281_v7 = vld [vmem:[%s277_s18 + $0x10] sm:$0xff]  ;;  %s266_s18 = sand.u32 1, %s799_s22   ;;  %s520_s8 = sadd.s32 %s634_s17, %s633_s16 }
  0x21   : > { %619 = vmatmul.msk.f32.vlgmr.msra.gmra.mxu1 %vm287_vm0, %v280_v4  ;;  %v361_v5 = vrot.slane %v280_v4, 4  ;;  %v360_v6 = vrot.slane %v279_v3, 4  ;;  %618 = vmatmul.msk.f32.vlgmr.msra.gmra.mxu0 %vm287_vm0, %v279_v3  ;;  %v324_v8 = vrot.slane %v280_v4, 2  ;;  %v323_v9 = vrot.slane %v279_v3, 2  ;;  %s616_s19 = sshll.u32 %s266_s18, 4  ;;  %s635_s30 = sshll.u32 %s520_s8, 3 }
  0x22   : > { %v363_v11 = vrot.slane %v281_v7, 4  ;;  %v326_v14 = vrot.slane %v281_v7, 2  ;;  %s522_s13 = scalar_lea.hbm %s1023_s6, %s635_s30  ;;  %s509_s16 = scalar_lea.sflag [#allocation3], %s266_s18 }
  0x23   : > { %v362_v10 = vsel %vm359_vm1, %v360_v6, %v361_v5  ;;  %v325_v12 = vsel %vm322_vm2, %v323_v9, %v324_v8  ;;  %s525_s25 = sshll.u32 %s522_s13, 4  ;;  %s526_s25 = int_to_ptr.hbm [resolvable:$true] %s525_s25 }
  0x24   : > { %624 = vmatmul.msk.f32.vlgmr.msra.gmra.mxu2 %vm287_vm0, %v362_v10  ;;  %v364_v13 = vsel %vm359_vm1, %v361_v5, %v363_v11  ;;  %v327_v15 = vsel %vm322_vm2, %v324_v8, %v326_v14  ;;  %628 = vmatmul.msk.f32.vlgmr.msra.gmra.mxu3 %vm287_vm0, %v362_v10  ;;  %s743_s17 = sshra.s32 %s526_s25, 4  ;;  %s744_s17 = int_to_ptr.hbm [resolvable:$true] %s743_s17 }
  0x25   : > { %s745_s8 = scalar_lea.hbm %s744_s17, 16  ;;  %p750_p4 = scmp.lt.s32.totalorder %s744_s17, %s1023_s6 }
  0x26   : > { %p746_p0 = scmp.ne.s32.totalorder %s744_s17, %s745_s8  ;;  %p751_p5 = scmp.lt.s32.totalorder %s749_s29, %s745_s8 }
  0x28   : > { %p747_p1 = pnand %p746_p0, %p914_p3  ;;  %p752_p6 = por %p751_p5, %p750_p4 }
  0x29   : > { %621 = vmatmul.msk.f32.vlgmr.msrb.gmra.mxu1 %vm287_vm0, %v325_v12 }
  0x2a   : > { %p748_p2 = pneg %p747_p1 }
  0x2c   : > { %625 = vmatmul.msk.f32.gmra.mxu2 %vm287_vm0, %v364_v13  ;;  %629 = vmatmul.msk.f32.gmra.mxu3 %vm287_vm0, %v364_v13  ;;  %p753_p7 = pnand %p752_p6, %p748_p2 }
  0x31   : > { %622 = vmatmul.msk.f32.gmra.mxu1 %vm287_vm0, %v327_v15 }
  0x9e   : > { %v314_v16 = vpop.f32.mrf.mxu1  ;;  %v311_v17 = vpop.f32.mrf.mxu0 }
  0x9f   : > { %v317_v19 = vadd.f32 %v715_v18, %v311_v17  ;;  %v318_v25 = vadd.f32 %v715_v18, %v314_v16 }
  0xa6   : > { %v349_v20 = vpop.f32.mrf.mxu1 }
  0xa7   : > { %v355_v21 = vadd.f32 %v349_v20, %v317_v19  ;;  %v386_v22 = vpop.f32.mrf.mxu2  ;;  %v464_v0 = vpop.f32.mrf.mxu3 }
  0xa9   : > { %v392_v23 = vadd.f32 %v386_v22, %v355_v21 }
  0xab   : > { %v626_v24 = vmul.f32 -1.442695, %v392_v23 }
  0xad   : > { %717 = vpow2.f32 %v626_v24 }
  0xae   : > { %v352_v26 = vpop.f32.mrf.mxu1 }
  0xaf   : > { %v356_v27 = vadd.f32 %v352_v26, %v318_v25  ;;  %v389_v28 = vpop.f32.mrf.mxu2  ;;  %v467_v5 = vpop.f32.mrf.mxu3 }
  0xb1   : > { %v393_v32 = vadd.f32 %v389_v28, %v356_v27 }
  0xb3   : > { %v718_v33 = vpop.eup %717  ;;  %v627_v34 = vmul.f32 -1.442695, %v393_v32 }
  0xb4   : > { %v402_v35 = vadd.f32 1.0, %v718_v33 }
  0xb5   : > { %719 = vpow2.f32 %v627_v34 }
  0xb6   : > { %721 = vrcp.f32 %v402_v35  ;;  %v415_v41 = vand.u32 2147483648, %v402_v35  ;;  %v413_v43 = vand.u32 2147483647, %v402_v35  ;;  %vm409_vm4 = vweird.f32 %v402_v35 }
  0xb8   : > { %v416_v46 = vor.u32 1.1754944e-38, %v415_v41  ;;  %vm414_vm6 = vcmp.eq.f32.partialorder %v413_v43, 8.507059e+37 }
  0xbb   : > { %v720_v36 = vpop.eup %719 }
  0xbc   : > { %v722_v37 = vpop.eup %721  ;;  %v403_v38 = vadd.f32 1.0, %v720_v36 }
  0xbd   : > { %v405_v39 = vmul.f32 %v722_v37, %v402_v35  ;;  %vm410_vm3 = vweird.f32 %v722_v37 }
  0xbe   : > { %723 = vrcp.f32 %v403_v38  ;;  %vm411_vm5 = vmor %vm409_vm4, %vm410_vm3  ;;  %v430_v51 = vand.u32 2147483648, %v403_v38  ;;  %v428_v53 = vand.u32 2147483647, %v403_v38  ;;  %vm424_vm8 = vweird.f32 %v403_v38 }
  0xbf   : > { %v406_v40 = vsub.f32 1.0, %v405_v39  ;;  %725 = vtanh.f32 %v392_v23 }
  0xc0   : > { %v431_v55 = vor.u32 1.1754944e-38, %v430_v51  ;;  %vm429_vm10 = vcmp.eq.f32.partialorder %v428_v53, 8.507059e+37  ;;  %727 = vtanh.f32 %v393_v32 }
  0xc1   : > { %v407_v42 = vmul.f32 %v722_v37, %v406_v40 }
  0xc3   : > { %v408_v44 = vadd.f32 %v722_v37, %v407_v42 }
  0xc4   : > { %v724_v45 = vpop.eup %723 }
  0xc5   : > { %v412_v47 = vsel %vm411_vm5, %v722_v37, %v408_v44  ;;  %v420_v48 = vmul.f32 %v724_v45, %v403_v38  ;;  %vm425_vm7 = vweird.f32 %v724_v45  ;;  %v726_v58 = vpop.eup %725 }
  0xc6   : > { %v417_v49 = vsel %vm414_vm6, %v416_v46, %v412_v47  ;;  %vm426_vm9 = vmor %vm424_vm8, %vm425_vm7  ;;  %v728_v61 = vpop.eup %727 }
  0xc7   : > { %436 = vrot.lane.b32.xlu0 %v417_v49, %s825_s14  ;;  %v421_v50 = vsub.f32 1.0, %v420_v48 }
  0xc9   : > { %v422_v52 = vmul.f32 %v724_v45, %v421_v50 }
  0xcb   : > { %v423_v54 = vadd.f32 %v724_v45, %v422_v52 }
  0xcd   : > { %v427_v56 = vsel %vm426_vm9, %v724_v45, %v423_v54 }
  0xce   : > { %v432_v57 = vsel %vm429_vm10, %v431_v55, %v427_v56 }
  0xcf   : > { %438 = vrot.lane.b32.xlu0 %v432_v57, %s825_s14  ;;  %s268_s14 = scalar_lea.vmem [#allocation2], %s616_s19 }
  0xd0   : > { %s523_s24 = sshll.u32 %s268_s14, 4  ;;  %s524_s24 = int_to_ptr.vmem [resolvable:$true] %s523_s24 }
 0x139   : > { %v437_v59 = vpop.permute.xlu0 %436 }
 0x13a   : > { %v442_v60 = vmul.f32 %v726_v58, %v437_v59 }
 0x13c   : > { %630 = vmatmul.msk.f32.vlgmr.msrb.gmra.mxu0 %vm470_vm11, %v442_v60 }
 0x141   : > { %v439_v62 = vpop.permute.xlu0 %438 }
 0x142   : > { %v443_v63 = vmul.f32 %v728_v61, %v439_v62 }
 0x144   : > { %631 = vmatmul.msk.f32.gmra.mxu0 %vm470_vm11, %v443_v63 }
 0x1b9   : > { %v494_v2 = vpop.f32.mrf.mxu0 }
 0x1ba   : > { %v495_v3 = vadd.f32 %v494_v2, %v464_v0 }
 0x1bc   : > { %v504_v4 = vadd.f32 %v716_v1, %v495_v3 }
 0x1be   : > { %506 = vst [vmem:[%s268_s14] sm:$0xff] %v504_v4 }
 0x1c1   : > { %v497_v6 = vpop.f32.mrf.mxu0 }
 0x1c2   : > { %v498_v7 = vadd.f32 %v497_v6, %v467_v5 }
 0x1c4   : > { %v505_v8 = vadd.f32 %v716_v1, %v498_v7 }
 0x1c6   : > { %507 = vst [vmem:[%s268_s14 + $0x8] sm:$0xff] %v505_v8 }
 0x1c7   : > { %756 = shalt.err (!%p753_p7)
}
 0x1c8   : > { %s826_s18 = smov 128   ;;  %s827_s12 = smov 8  }
 0x1c9   : > { %641 = dma.vmem_to_hbm [thread:$0]  (%p914_p3), %s524_s24, 256, %s526_s25, %s509_s16, %s826_s18, %s826_s18, %s827_s12  }
 0x1ca PF: > { %p647_p9 = scmp.ge.s32.totalorder %s823_s28, 2  ;;  %s540_s13 = sand.u32 1, %s795_s21  }
 0x1cb   : > { %s541_s14 = scalar_lea.sflag [#allocation3], %s540_s13 }
 0x1cc   : > { %p644_p10 = pnand %p647_p9, %p923_p8 }
 0x1ce   : > { %p645_p11 = pneg %p644_p10 }
 0x1d0   : > { %790 = dma.done.wait (%p645_p11), %s541_s14, 256  }
 0x1d1   : > { %792 = vsyncadd (%p645_p11), %s541_s14, 4294967040  ;;  %s19_s28 = sadd.s32 1, %s823_s28   ;;  %s1028_s10 = sld [smem:[#allocation5_spill]] }
 0x1d2   : > { %p16_p12 = scmp.ge.s32.totalorder %s19_s28, 10   ;;  %s1029_s21 = smov %s799_s22 }
 0x1d3   : > { %s1030_s22 = smov %s803_s23  ;;  %s1031_s23 = smov %s932_s15 }
 0x1d4   : > { %s1032_s24 = smov %s815_s26  ;;  %s1033_s25 = smov %s819_s27 }
 0x1d5   : > { %s1034_s26 = smov %s1037_s7  ;;  %18 = sbr.rel (!%p16_p12) target bundleno = 5 (0x5), region = 81 }
 0x1d7   : > { %s1035_s27 = smov %s1028_s10 }
 0x1da   :  { %547 = vsyncpa [#allocation3], 1 }
 0x1db   :  { %549 = vsyncpa [#allocation3 + $0x1], 1 }

</bundles_post_ra>
